<compile_context>
chip_gen: v7x
topology: tpu7x:2x2x1
jax: 0.10.0
libtpu: 0.0.40
codegen_flags: <defaults>
</compile_context>

<pallas_src>
import functools

import jax
import jax.numpy as jnp
from jax.experimental import pallas as pl
from jax.experimental.pallas import tpu as pltpu

D_IN = 500          # logical feature width of each input half
D_PAD = 512         # lane-aligned feature width
D2 = 20             # dim2 of the module
D2_PAD = 128        # lane-aligned hidden width
DEFAULT_TM = 512    # batch tile (rows per grid step)


def _round_up(n, m):
    return ((n + m - 1) // m) * m


def _pad2d(a, shape, dtype=None):
    out = jnp.pad(a, [(0, s - d) for d, s in zip(a.shape, shape)])
    return out.astype(dtype) if dtype is not None else out


def masked_model2_kernel(x_ref, w_fused_ref, b_mask_ref, w1_ref, b1_ref,
                         w_out_ref, b_out_ref, out_ref):
    x = x_ref[...]                                    # (TM, 1024) bf16
    x_sys = x[:, :D_PAD]                              # (TM, 512) bf16, static lane-aligned slice

    # mask = (x_sys @ Wsys + x_ref @ Wref) @ Wmask + b_mask, pre-fused into ONE matmul
    mask = jnp.dot(x, w_fused_ref[...],
                   preferred_element_type=jnp.float32) + b_mask_ref[...]    # (TM, 512) f32

    masked_sys = mask * x_sys.astype(jnp.float32)                           # (TM, 512) f32

    # li_1: 512 -> 128 (20 real cols), Tanh (EUP)
    hidden = jnp.tanh(jnp.dot(masked_sys.astype(jnp.bfloat16), w1_ref[...],
                              preferred_element_type=jnp.float32)
                      + b1_ref[...])                                        # (TM, 128) f32

    # li_out: 20 -> 1 as VPU multiply + lane reduction (skip a wasteful N=1 MXU pass)
    out = jnp.sum(hidden * w_out_ref[...], axis=-1, keepdims=True) + b_out_ref[0, 0]
    out_ref[...] = out.astype(out_ref.dtype)                                # (TM, 1)


def prepare_params(p):
    """Pad to aligned shapes, fold the three mask-path matmuls into one, cast to bf16."""
    w_sys_p = _pad2d(p["w_sys"], (D_PAD, D_PAD))
    w_ref_p = _pad2d(p["w_ref"], (D_PAD, D_PAD))
    w_mask_p = _pad2d(p["w_mask"], (D_PAD, D_PAD))
    # (1024, 512) f32 product, then quantize once to bf16
    w_fused = jnp.concatenate([w_sys_p, w_ref_p], axis=0) @ w_mask_p
    return {
        "w_fused": w_fused.astype(jnp.bfloat16),                      # (1024, 512)
        "b_mask": _pad2d(p["b_mask"], (1, D_PAD), jnp.float32),       # (1, 512)
        "w1": _pad2d(p["w1"], (D_PAD, D2_PAD), jnp.bfloat16),         # (512, 128)
        "b1": _pad2d(p["b1"], (1, D2_PAD), jnp.float32),              # (1, 128)
        "w_out_row": _pad2d(p["w_out"].T, (1, D2_PAD), jnp.float32),  # (1, 128)
        "b_out": p["b_out"].astype(jnp.float32),                      # (1, 1) -> SMEM
    }


def prepare_input(x, b_pad):
    """(B, 1000) f32 -> (B_pad, 1024) bf16 with each 500-wide half zero-padded to 512."""
    B = x.shape[0]
    x_sys = jnp.pad(x[:, :D_IN], ((0, b_pad - B), (0, D_PAD - D_IN)))
    x_ref = jnp.pad(x[:, D_IN:], ((0, b_pad - B), (0, D_PAD - D_IN)))
    return jnp.concatenate([x_sys, x_ref], axis=1).astype(jnp.bfloat16)


@functools.partial(jax.jit, static_argnames=("tm",))
def masked_model2_forward(x, prep, *, tm=DEFAULT_TM):
    """x: (B, 1000) float32.  prep: output of prepare_params."""
    B = x.shape[0]
    tm_eff = min(tm, _round_up(B, 16))      # don't over-pad tiny batches
    b_pad = _round_up(B, tm_eff)
    x_pad = prepare_input(x, b_pad)

    out = pl.pallas_call(
        masked_model2_kernel,
        out_shape=jax.ShapeDtypeStruct((b_pad, 1), jnp.float32),
        grid=(b_pad // tm_eff,),
        in_specs=[
            pl.BlockSpec((tm_eff, 2 * D_PAD), lambda i: (i, 0)),   # x tile (pipelined)
            pl.BlockSpec((2 * D_PAD, D_PAD), lambda i: (0, 0)),    # W_fused (resident)
            pl.BlockSpec((1, D_PAD), lambda i: (0, 0)),            # b_mask
            pl.BlockSpec((D_PAD, D2_PAD), lambda i: (0, 0)),       # W1
            pl.BlockSpec((1, D2_PAD), lambda i: (0, 0)),           # b1
            pl.BlockSpec((1, D2_PAD), lambda i: (0, 0)),           # w_out row
            pl.BlockSpec(memory_space=pltpu.MemorySpace.SMEM),     # b_out scalar
        ],
        out_specs=pl.BlockSpec((tm_eff, 1), lambda i: (i, 0)),
        compiler_params=pltpu.CompilerParams(
            dimension_semantics=("parallel",)),
    )(x_pad, prep["w_fused"], prep["b_mask"], prep["w1"], prep["b1"],
      prep["w_out_row"], prep["b_out"])
    return out[:B]


def init_params(key):
    """Deterministic parameter init (shapes from the module __init__).
    PyTorch Linear stores W as (out, in); we store the transposed (in, out)."""
    ks = jax.random.split(key, 8)
    s500 = 1.0 / jnp.sqrt(500.0)
    s20 = 1.0 / jnp.sqrt(20.0)
    return {
        "w_sys":  jax.random.uniform(ks[0], (D_IN, D_IN), jnp.float32, -s500, s500),
        "w_ref":  jax.random.uniform(ks[1], (D_IN, D_IN), jnp.float32, -s500, s500),
        "w_mask": jax.random.uniform(ks[2], (D_IN, D_IN), jnp.float32, -s500, s500),
        "b_mask": jax.random.uniform(ks[3], (1, D_IN), jnp.float32, -s500, s500),
        "w1":     jax.random.uniform(ks[4], (D_IN, D2), jnp.float32, -s500, s500),
        "b1":     jax.random.uniform(ks[5], (1, D2), jnp.float32, -s500, s500),
        "w_out":  jax.random.uniform(ks[6], (D2, 1), jnp.float32, -s20, s20),
        "b_out":  jax.random.uniform(ks[7], (1, 1), jnp.float32, -s20, s20),
    }


def reference_forward(x, p):
    """Pure-JAX f32 reference matching the original (unfused) PyTorch forward."""
    x_sys = x[:, :D_IN]
    x_ref = x[:, D_IN:]
    sum_in = x_sys @ p["w_sys"] + x_ref @ p["w_ref"]
    mask = sum_in @ p["w_mask"] + p["b_mask"]
    masked_sys = mask * x_sys
    hidden = jnp.tanh(masked_sys @ p["w1"] + p["b1"])
    return hidden @ p["w_out"] + p["b_out"]


def matched_reference(x, prep):
    """Same fused/padded bf16 math as the kernel (precision-matched check)."""
    B = x.shape[0]
    x_pad = prepare_input(x, _round_up(B, 16))
    mask = jnp.dot(x_pad, prep["w_fused"],
                   preferred_element_type=jnp.float32) + prep["b_mask"]
    masked = mask * x_pad[:, :D_PAD].astype(jnp.float32)
    hidden = jnp.tanh(jnp.dot(masked.astype(jnp.bfloat16), prep["w1"],
                              preferred_element_type=jnp.float32) + prep["b1"])
    out = jnp.sum(hidden * prep["w_out_row"], axis=-1, keepdims=True) + prep["b_out"][0, 0]
    return out[:B]


if __name__ == "__main__":
    key = jax.random.PRNGKey(0)
    k_param, k_x = jax.random.split(key)

    raw_params = init_params(k_param)
    prep = prepare_params(raw_params)

    B = 2
    x = jax.random.normal(k_x, (B, 2 * D_IN), jnp.float32)   # (2, 1000)

    out = jax.block_until_ready(masked_model2_forward(x, prep))
    assert out.shape == (B, 1)

    # Precision-matched check: same fused bf16 ops done in plain XLA.
    ref_match = matched_reference(x, prep)
    assert jnp.allclose(out, ref_match, atol=5e-3, rtol=5e-3), (out, ref_match)

    # Semantic check vs. the original f32, unfused forward (bf16-level tolerance).
    ref_f32 = reference_forward(x, raw_params)
    assert jnp.allclose(out, ref_f32, atol=5e-2, rtol=5e-2), (out, ref_f32)

    print("KERNEL_OK")
</pallas_src>

<mosaic_0001>
module attributes {stable_mosaic.version = 11 : i64} {
  func.func @masked_model2_kernel(%arg0: i32, %arg1: memref<16x1024xbf16, #tpu.memory_space<vmem>>, %arg2: memref<1024x512xbf16, #tpu.memory_space<vmem>>, %arg3: memref<1x512xf32, #tpu.memory_space<vmem>>, %arg4: memref<512x128xbf16, #tpu.memory_space<vmem>>, %arg5: memref<1x128xf32, #tpu.memory_space<vmem>>, %arg6: memref<1x128xf32, #tpu.memory_space<vmem>>, %arg7: memref<1x1xf32, #tpu.memory_space<smem>>, %arg8: memref<16x1xf32, #tpu.memory_space<vmem>>) attributes {dimension_semantics = [#tpu.dimension_semantics<parallel>], iteration_bounds = array<i64: 1>, scalar_prefetch = 0 : i64, scratch_operands = 0 : i64, tpu.core_type = #tpu.core_type<tc>, window_params = [{transform_indices = @transform_0, window_bounds = array<i64: 16, 1024>}, {pipeline_mode = #tpu.pipeline_mode<synchronous>, transform_indices = @transform_1, window_bounds = array<i64: 1024, 512>}, {pipeline_mode = #tpu.pipeline_mode<synchronous>, transform_indices = @transform_2, window_bounds = array<i64: 1, 512>}, {pipeline_mode = #tpu.pipeline_mode<synchronous>, transform_indices = @transform_3, window_bounds = array<i64: 512, 128>}, {pipeline_mode = #tpu.pipeline_mode<synchronous>, transform_indices = @transform_4, window_bounds = array<i64: 1, 128>}, {pipeline_mode = #tpu.pipeline_mode<synchronous>, transform_indices = @transform_5, window_bounds = array<i64: 1, 128>}, {transform_indices = @transform_6, window_bounds = array<i64: 1, 1>}, {transform_indices = @transform_7, window_bounds = array<i64: 16, 1>}]} {
    %c0 = arith.constant 0 : index
    %c0_0 = arith.constant 0 : index
    %0 = vector.load %arg1[%c0, %c0_0] : memref<16x1024xbf16, #tpu.memory_space<vmem>>, vector<16x1024xbf16>
    %1 = vector.extract_strided_slice %0 {offsets = [0, 0], sizes = [16, 512], strides = [1, 1]} : vector<16x1024xbf16> to vector<16x512xbf16>
    %c0_1 = arith.constant 0 : index
    %c0_2 = arith.constant 0 : index
    %2 = vector.load %arg2[%c0_1, %c0_2] : memref<1024x512xbf16, #tpu.memory_space<vmem>>, vector<1024x512xbf16>
    %cst = arith.constant dense<0.000000e+00> : vector<16x512xf32>
    %3 = tpu.matmul %0, %2, %cst {dimension_numbers = #tpu.dot_dimension_numbers<[1], [0], [0], [1], [0, 0, 1, 1], [], []>} : vector<16x1024xbf16>, vector<1024x512xbf16>, vector<16x512xf32> -> vector<16x512xf32>
    %c0_3 = arith.constant 0 : index
    %c0_4 = arith.constant 0 : index
    %4 = vector.load %arg3[%c0_3, %c0_4] : memref<1x512xf32, #tpu.memory_space<vmem>>, vector<1x512xf32>
    %5 = vector.broadcast %4 : vector<1x512xf32> to vector<16x512xf32>
    %6 = arith.addf %3, %5 : vector<16x512xf32>
    %7 = arith.extf %1 : vector<16x512xbf16> to vector<16x512xf32>
    %8 = arith.mulf %6, %7 : vector<16x512xf32>
    %9 = arith.truncf %8 : vector<16x512xf32> to vector<16x512xbf16>
    %c0_5 = arith.constant 0 : index
    %c0_6 = arith.constant 0 : index
    %10 = vector.load %arg4[%c0_5, %c0_6] : memref<512x128xbf16, #tpu.memory_space<vmem>>, vector<512x128xbf16>
    %cst_7 = arith.constant dense<0.000000e+00> : vector<16x128xf32>
    %11 = tpu.matmul %9, %10, %cst_7 {dimension_numbers = #tpu.dot_dimension_numbers<[1], [0], [0], [1], [0, 0, 1, 1], [], []>} : vector<16x512xbf16>, vector<512x128xbf16>, vector<16x128xf32> -> vector<16x128xf32>
    %c0_8 = arith.constant 0 : index
    %c0_9 = arith.constant 0 : index
    %12 = vector.load %arg5[%c0_8, %c0_9] : memref<1x128xf32, #tpu.memory_space<vmem>>, vector<1x128xf32>
    %13 = vector.broadcast %12 : vector<1x128xf32> to vector<16x128xf32>
    %14 = arith.addf %11, %13 : vector<16x128xf32>
    %15 = math.tanh %14 : vector<16x128xf32>
    %c0_10 = arith.constant 0 : index
    %c0_11 = arith.constant 0 : index
    %16 = vector.load %arg6[%c0_10, %c0_11] : memref<1x128xf32, #tpu.memory_space<vmem>>, vector<1x128xf32>
    %17 = vector.broadcast %16 : vector<1x128xf32> to vector<16x128xf32>
    %18 = arith.mulf %15, %17 : vector<16x128xf32>
    %cst_12 = arith.constant dense<0.000000e+00> : vector<16xf32>
    %19 = vector.multi_reduction <add>, %18, %cst_12 [1] : vector<16x128xf32> to vector<16xf32>
    %20 = vector.shape_cast %19 : vector<16xf32> to vector<16x1xf32>
    %c0_13 = arith.constant 0 : index
    %c0_14 = arith.constant 0 : index
    %21 = memref.load %arg7[%c0_13, %c0_14] : memref<1x1xf32, #tpu.memory_space<smem>>
    %22 = vector.broadcast %21 : f32 to vector<16x1xf32>
    %23 = arith.addf %20, %22 : vector<16x1xf32>
    %c0_15 = arith.constant 0 : index
    %c0_16 = arith.constant 0 : index
    %24 = vector.load %arg8[%c0_15, %c0_16] : memref<16x1xf32, #tpu.memory_space<vmem>>, vector<16x1xf32>
    tpu.vector_store %arg8[%c0_15, %c0_16], %23 {strides = array<i32>} : memref<16x1xf32, #tpu.memory_space<vmem>>, vector<16x1xf32>,
    return
  }
  func.func @transform_0(%arg0: i32) -> (i32, i32) {
    %c0_i32 = arith.constant 0 : i32
    %c0_i32_0 = arith.constant 0 : i32
    return %arg0, %c0_i32 : i32, i32
  }
  func.func @transform_1(%arg0: i32) -> (i32, i32) {
    %c0_i32 = arith.constant 0 : i32
    %c0_i32_0 = arith.constant 0 : i32
    %c0_i32_1 = arith.constant 0 : i32
    return %c0_i32, %c0_i32_0 : i32, i32
  }
  func.func @transform_2(%arg0: i32) -> (i32, i32) {
    %c0_i32 = arith.constant 0 : i32
    %c0_i32_0 = arith.constant 0 : i32
    %c0_i32_1 = arith.constant 0 : i32
    return %c0_i32, %c0_i32_0 : i32, i32
  }
  func.func @transform_3(%arg0: i32) -> (i32, i32) {
    %c0_i32 = arith.constant 0 : i32
    %c0_i32_0 = arith.constant 0 : i32
    %c0_i32_1 = arith.constant 0 : i32
    return %c0_i32, %c0_i32_0 : i32, i32
  }
  func.func @transform_4(%arg0: i32) -> (i32, i32) {
    %c0_i32 = arith.constant 0 : i32
    %c0_i32_0 = arith.constant 0 : i32
    %c0_i32_1 = arith.constant 0 : i32
    return %c0_i32, %c0_i32_0 : i32, i32
  }
  func.func @transform_5(%arg0: i32) -> (i32, i32) {
    %c0_i32 = arith.constant 0 : i32
    %c0_i32_0 = arith.constant 0 : i32
    %c0_i32_1 = arith.constant 0 : i32
    return %c0_i32, %c0_i32_0 : i32, i32
  }
  func.func @transform_6(%arg0: i32) -> (i32, i32) {
    %c0_i32 = arith.constant 0 : i32
    %c0_i32_0 = arith.constant 0 : i32
    %c0_i32_1 = arith.constant 0 : i32
    return %c0_i32, %c0_i32_0 : i32, i32
  }
  func.func @transform_7(%arg0: i32) -> (i32, i32) {
    %c0_i32 = arith.constant 0 : i32
    %c0_i32_0 = arith.constant 0 : i32
    return %arg0, %c0_i32 : i32, i32
  }
}

</mosaic_0001>

<bundles_post_ra>
// kernel: masked_model2_forward.1
= control target key start
LH: loop header
LB: loop body
LE: loop exit
PB: predicated region body
PF: predicated region fallthrough
CT: control target
= control target key end

     0   :  { %13 = vsyncpa [#allocation4], 0  ;;  %s3399_s0 = inlined_call_operand.vmem [shape: bf16[16,1024], index: 0, kind: input, shape index: {}]   ;;  %s3400_s1 = inlined_call_operand.hbm [shape: bf16[1024,512], index: 1, kind: input, shape index: {}]   ;;  %s3401_s2 = inlined_call_operand.vmem [shape: f32[1,512], index: 2, kind: input, shape index: {}]   ;;  %s3402_s3 = inlined_call_operand.hbm [shape: bf16[512,128], index: 3, kind: input, shape index: {}]   ;;  %s3403_s4 = inlined_call_operand.vmem [shape: f32[1,128], index: 4, kind: input, shape index: {}]   ;;  %s3404_s5 = inlined_call_operand.vmem [shape: f32[1,128], index: 5, kind: input, shape index: {}]   ;;  %s3405_s6 = inlined_call_operand.<no memory space> [shape: f32[1,1], index: 6, kind: input, shape index: {}]   ;;  %s3406_s7 = inlined_call_operand.vmem [shape: f32[16,1], index: 7, kind: output, shape index: {}]  }
   0x1   :  { %14 = vsyncpa [#allocation6], 0  ;;  %s3251_s24 = smov [#allocation3]   ;;  %s3203_s28 = scalar_lea.hbm %s3400_s1, 32768 }
   0x2   :  { %s22_s25 = sshll.u32 %s3251_s24, 4  ;;  %p3204_p0 = scmp.ne.s32.totalorder %s3400_s1, %s3203_s28  ;;  %s23_s25 = int_to_ptr.vmem [resolvable:$true] %s22_s25 }
   0x3   :  { %p3207_p1 = scmp.lt.u32.totalorder %s3203_s28, %s3400_s1 }
   0x5   :  { %p3209_p2 = pnand %p3207_p1, %p3204_p0 }
   0x7   :  { %3212 = shalt.err (!%p3209_p2)
}
   0x8   :  { %s3213_s10 = scalar_lea.vmem %s23_s25, 32768  ;;  %p3218_p4 = scmp.lt.s32.totalorder %s23_s25, %s23_s25 }
   0x9   :  { %p3214_p3 = scmp.ne.s32.totalorder %s23_s25, %s3213_s10  ;;  %p3219_p5 = scmp.lt.s32.totalorder %s3213_s10, %s3213_s10 }
   0xb   :  { %p3220_p6 = por %p3219_p5, %p3218_p4 }
   0xd   :  { %p3221_p7 = pnand %p3220_p6, %p3214_p3 }
   0xf   :  { %3224 = shalt.err (!%p3221_p7)
}
  0x10   :  { %s3252_s11 = smov 256   ;;  %s3253_s12 = smov 16  }
  0x11   :  { %28 = dma.hbm_to_vmem [thread:$0]  %s3400_s1, 32768, %s23_s25, [#allocation4], %s3252_s11, %s3252_s11, %s3253_s12  }
  0x12   :  { %s3254_s15 = smov [#allocation5]   ;;  %s3225_s19 = scalar_lea.hbm %s3402_s3, 4096 }
  0x13   :  { %s36_s16 = sshll.u32 %s3254_s15, 4  ;;  %p3226_p8 = scmp.ne.s32.totalorder %s3402_s3, %s3225_s19  ;;  %s37_s16 = int_to_ptr.vmem [resolvable:$true] %s36_s16 }
  0x14   :  { %p3229_p9 = scmp.lt.u32.totalorder %s3225_s19, %s3402_s3 }
  0x16   :  { %p3231_p10 = pnand %p3229_p9, %p3226_p8 }
  0x18   :  { %3234 = shalt.err (!%p3231_p10)
}
  0x19   :  { %s3235_s24 = scalar_lea.vmem %s37_s16, 4096  ;;  %p3240_p12 = scmp.lt.s32.totalorder %s37_s16, %s37_s16 }
  0x1a   :  { %p3236_p11 = scmp.ne.s32.totalorder %s37_s16, %s3235_s24  ;;  %p3241_p13 = scmp.lt.s32.totalorder %s3235_s24, %s3235_s24 }
  0x1c   :  { %p3242_p0 = por %p3241_p13, %p3240_p12 }
  0x1e   :  { %p3243_p1 = pnand %p3242_p0, %p3236_p11 }
  0x20   :  { %3246 = shalt.err (!%p3243_p1)
}
  0x21   :  { %s3255_s1 = smov 64   ;;  %s3256_s25 = smov 4  }
  0x22   :  { %42 = dma.hbm_to_vmem [thread:$0]  %s3402_s3, 4096, %s37_s16, [#allocation6], %s3255_s1, %s3255_s1, %s3256_s25  }
  0x23   :  { %3247 = dma.done.wait [#allocation4], 32768  }
  0x24   :  { %3248 = vsyncadd [#allocation4], 4294934528 }
  0x25   :  { %3249 = dma.done.wait [#allocation6], 4096  }
  0x26   :  { %3250 = vsyncadd [#allocation6], 4294963200  ;;  %v2779_v0 = vld [vmem:[#allocation3 + $0x4] ss:$16 sps:$4 sm:$0xff]   ;;  %v2781_v1 = vld [vmem:[#allocation3 + $0xc] ss:$16 sps:$4 sm:$0xff]  }
  0x27   :  { %1662 = vmatprep.subr.bf16.mxu0 %v2779_v0  ;;  %v2783_v2 = vld [vmem:[#allocation3] ss:$16 sps:$4 sm:$0xff]   ;;  %v2784_v3 = vld [vmem:[#allocation3 + $0x8] ss:$16 sps:$4 sm:$0xff]   ;;  %1834 = vmatprep.subr.bf16.mxu1 %v2781_v1  ;;  %v2785_v4 = vld [vmem:[#allocation3 + $0x24] ss:$16 sps:$4 sm:$0xff]  }
  0x28   :  { %1663 = vmatpush1.bf16.msra.mxu0 %v2783_v2  ;;  %1835 = vmatpush1.bf16.msra.mxu1 %v2784_v3  ;;  %v2787_v5 = vld [vmem:[#allocation3 + $0x2c] ss:$16 sps:$4 sm:$0xff]   ;;  %v2789_v6 = vld [vmem:[#allocation3 + $0x20] ss:$16 sps:$4 sm:$0xff]   ;;  %v2790_v7 = vld [vmem:[#allocation3 + $0x28] ss:$16 sps:$4 sm:$0xff]  }
  0x29   :  { %1664 = vmatprep.subr.bf16.mxu0 %v2785_v4  ;;  %1836 = vmatprep.subr.bf16.mxu1 %v2787_v5  ;;  %v2791_v8 = vld [vmem:[#allocation3 + $0x44] ss:$16 sps:$4 sm:$0xff]   ;;  %v2793_v9 = vld [vmem:[#allocation3 + $0x4c] ss:$16 sps:$4 sm:$0xff]   ;;  %v2795_v10 = vld [vmem:[#allocation3 + $0x40] ss:$16 sps:$4 sm:$0xff]  }
  0x2a   :  { %v2796_v11 = vld [vmem:[#allocation3 + $0x48] ss:$16 sps:$4 sm:$0xff]   ;;  %v2797_v12 = vld [vmem:[#allocation3 + $0x64] ss:$16 sps:$4 sm:$0xff]   ;;  %v2799_v13 = vld [vmem:[#allocation3 + $0x6c] ss:$16 sps:$4 sm:$0xff]  }
  0x2b   :  { %v2801_v14 = vld [vmem:[#allocation3 + $0x60] ss:$16 sps:$4 sm:$0xff]   ;;  %v2802_v15 = vld [vmem:[#allocation3 + $0x68] ss:$16 sps:$4 sm:$0xff]   ;;  %v2803_v16 = vld [vmem:[#allocation3 + $0x84] ss:$16 sps:$4 sm:$0xff]  }
  0x2c   :  { %1665 = vmatpush1.bf16.msra.mxu0 %v2789_v6  ;;  %1837 = vmatpush1.bf16.msra.mxu1 %v2790_v7  ;;  %v2805_v17 = vld [vmem:[#allocation3 + $0x8c] ss:$16 sps:$4 sm:$0xff]   ;;  %v2807_v18 = vld [vmem:[#allocation3 + $0x80] ss:$16 sps:$4 sm:$0xff]   ;;  %v2808_v19 = vld [vmem:[#allocation3 + $0x88] ss:$16 sps:$4 sm:$0xff]  }
  0x2d   :  { %1666 = vmatprep.subr.bf16.mxu0 %v2791_v8  ;;  %1838 = vmatprep.subr.bf16.mxu1 %v2793_v9  ;;  %v2809_v20 = vld [vmem:[#allocation3 + $0xa4] ss:$16 sps:$4 sm:$0xff]   ;;  %v2811_v21 = vld [vmem:[#allocation3 + $0xac] ss:$16 sps:$4 sm:$0xff]   ;;  %v2813_v22 = vld [vmem:[#allocation3 + $0xa0] ss:$16 sps:$4 sm:$0xff]  }
  0x2e   :  { %v2814_v23 = vld [vmem:[#allocation3 + $0xa8] ss:$16 sps:$4 sm:$0xff]   ;;  %v2815_v24 = vld [vmem:[#allocation3 + $0xc4] ss:$16 sps:$4 sm:$0xff]   ;;  %v2817_v25 = vld [vmem:[#allocation3 + $0xcc] ss:$16 sps:$4 sm:$0xff]  }
  0x2f   :  { %v2819_v26 = vld [vmem:[#allocation3 + $0xc0] ss:$16 sps:$4 sm:$0xff]   ;;  %v2820_v27 = vld [vmem:[#allocation3 + $0xc8] ss:$16 sps:$4 sm:$0xff]   ;;  %v2821_v28 = vld [vmem:[#allocation3 + $0xe4] ss:$16 sps:$4 sm:$0xff]  }
  0x30   :  { %1667 = vmatpush1.bf16.msra.mxu0 %v2795_v10  ;;  %1839 = vmatpush1.bf16.msra.mxu1 %v2796_v11  ;;  %v2823_v29 = vld [vmem:[#allocation3 + $0xec] ss:$16 sps:$4 sm:$0xff]   ;;  %v2825_v30 = vld [vmem:[#allocation3 + $0xe0] ss:$16 sps:$4 sm:$0xff]   ;;  %v2826_v31 = vld [vmem:[#allocation3 + $0xe8] ss:$16 sps:$4 sm:$0xff]  }
  0x31   :  { %1668 = vmatprep.subr.bf16.mxu0 %v2797_v12  ;;  %1840 = vmatprep.subr.bf16.mxu1 %v2799_v13  ;;  %v2827_v32 = vld [vmem:[#allocation3 + $0x104] ss:$16 sps:$4 sm:$0xff]   ;;  %v2829_v33 = vld [vmem:[#allocation3 + $0x10c] ss:$16 sps:$4 sm:$0xff]   ;;  %v2831_v34 = vld [vmem:[#allocation3 + $0x100] ss:$16 sps:$4 sm:$0xff]  }
  0x32   :  { %v2832_v35 = vld [vmem:[#allocation3 + $0x108] ss:$16 sps:$4 sm:$0xff]   ;;  %v2833_v36 = vld [vmem:[#allocation3 + $0x124] ss:$16 sps:$4 sm:$0xff]   ;;  %v2835_v37 = vld [vmem:[#allocation3 + $0x12c] ss:$16 sps:$4 sm:$0xff]  }
  0x33   :  { %v2837_v38 = vld [vmem:[#allocation3 + $0x120] ss:$16 sps:$4 sm:$0xff]   ;;  %v2838_v39 = vld [vmem:[#allocation3 + $0x128] ss:$16 sps:$4 sm:$0xff]   ;;  %v2839_v40 = vld [vmem:[#allocation3 + $0x144] ss:$16 sps:$4 sm:$0xff]  }
  0x34   :  { %1669 = vmatpush1.bf16.msra.mxu0 %v2801_v14  ;;  %1841 = vmatpush1.bf16.msra.mxu1 %v2802_v15  ;;  %v2841_v41 = vld [vmem:[#allocation3 + $0x14c] ss:$16 sps:$4 sm:$0xff]   ;;  %v2843_v42 = vld [vmem:[#allocation3 + $0x140] ss:$16 sps:$4 sm:$0xff]   ;;  %v2844_v43 = vld [vmem:[#allocation3 + $0x148] ss:$16 sps:$4 sm:$0xff]  }
  0x35   :  { %1670 = vmatprep.subr.bf16.mxu0 %v2803_v16  ;;  %1842 = vmatprep.subr.bf16.mxu1 %v2805_v17  ;;  %v2845_v44 = vld [vmem:[#allocation3 + $0x164] ss:$16 sps:$4 sm:$0xff]   ;;  %v2847_v45 = vld [vmem:[#allocation3 + $0x16c] ss:$16 sps:$4 sm:$0xff]   ;;  %v2849_v48 = vld [vmem:[#allocation3 + $0x160] ss:$16 sps:$4 sm:$0xff]  }
  0x36   :  { %v56_v46 = vld [vmem:[%s3399_s0] sm:$0xff]  ;;  %v2850_v49 = vld [vmem:[#allocation3 + $0x168] ss:$16 sps:$4 sm:$0xff]   ;;  %v2853_v52 = vld [vmem:[#allocation3 + $0x18c] ss:$16 sps:$4 sm:$0xff]   ;;  %vm2390_vm0 = vcmask 7168  }
  0x37   :  { %v60_v47 = vld [vmem:[%s3399_s0 + $0x20] sm:$0xff]  ;;  %v2856_v54 = vld [vmem:[#allocation3 + $0x188] ss:$16 sps:$4 sm:$0xff]   ;;  %v2859_v56 = vld [vmem:[#allocation3 + $0x1ac] ss:$16 sps:$4 sm:$0xff]  }
  0x38   :  { %1671 = vmatpush1.bf16.msra.mxu0 %v2807_v18  ;;  %1843 = vmatpush1.bf16.msra.mxu1 %v2808_v19  ;;  %v2400_v50 = vcombine.high %v56_v46, %v60_v47  ;;  %v2851_v51 = vld [vmem:[#allocation3 + $0x184] ss:$16 sps:$4 sm:$0xff]   ;;  %v2855_v53 = vld [vmem:[#allocation3 + $0x180] ss:$16 sps:$4 sm:$0xff]   ;;  %v2862_v58 = vld [vmem:[#allocation3 + $0x1a8] ss:$16 sps:$4 sm:$0xff]   ;;  %v2399_v5 = vcombine.low %v56_v46, %v60_v47 }
  0x39   :  { %1672 = vmatprep.subr.bf16.mxu0 %v2809_v20  ;;  %1844 = vmatprep.subr.bf16.mxu1 %v2811_v21  ;;  %v2857_v55 = vld [vmem:[#allocation3 + $0x1a4] ss:$16 sps:$4 sm:$0xff]   ;;  %v2861_v57 = vld [vmem:[#allocation3 + $0x1a0] ss:$16 sps:$4 sm:$0xff]   ;;  %v2865_v60 = vld [vmem:[#allocation3 + $0x1cc] ss:$16 sps:$4 sm:$0xff]  }
  0x3a   :  { %1694 = vmatprep.mubr.bf16.mxu0 %v2400_v50  ;;  %1866 = vmatprep.mubr.bf16.mxu1 %v2400_v50  ;;  %v2863_v59 = vld [vmem:[#allocation3 + $0x1c4] ss:$16 sps:$4 sm:$0xff]   ;;  %v2867_v61 = vld [vmem:[#allocation3 + $0x1c0] ss:$16 sps:$4 sm:$0xff]   ;;  %v2868_v62 = vld [vmem:[#allocation3 + $0x1c8] ss:$16 sps:$4 sm:$0xff]  }
  0x3b   :  { %v2869_v63 = vld [vmem:[#allocation3 + $0x1e4] ss:$16 sps:$4 sm:$0xff]   ;;  %v2871_v0 = vld [vmem:[#allocation3 + $0x1ec] ss:$16 sps:$4 sm:$0xff]   ;;  %v2873_v1 = vld [vmem:[#allocation3 + $0x1e0] ss:$16 sps:$4 sm:$0xff]  }
  0x3c   :  { %1673 = vmatpush1.bf16.msra.mxu0 %v2813_v22  ;;  %1845 = vmatpush1.bf16.msra.mxu1 %v2814_v23  ;;  %v2874_v2 = vld [vmem:[#allocation3 + $0x1e8] ss:$16 sps:$4 sm:$0xff]   ;;  %v2877_v3 = vld [vmem:[#allocation3 + $0x204] ss:$16 sps:$4 sm:$0xff]   ;;  %v2880_v4 = vld [vmem:[#allocation3 + $0x20c] ss:$16 sps:$4 sm:$0xff]  }
  0x3d   :  { %1674 = vmatprep.subr.bf16.mxu0 %v2815_v24  ;;  %1846 = vmatprep.subr.bf16.mxu1 %v2817_v25  ;;  %v2875_v6 = vld [vmem:[#allocation3 + $0x200] ss:$16 sps:$4 sm:$0xff]   ;;  %v2878_v7 = vld [vmem:[#allocation3 + $0x208] ss:$16 sps:$4 sm:$0xff]   ;;  %v2883_v8 = vld [vmem:[#allocation3 + $0x224] ss:$16 sps:$4 sm:$0xff]  }
  0x3e   :  { %v2886_v9 = vld [vmem:[#allocation3 + $0x22c] ss:$16 sps:$4 sm:$0xff]   ;;  %v2881_v10 = vld [vmem:[#allocation3 + $0x220] ss:$16 sps:$4 sm:$0xff]   ;;  %v2884_v11 = vld [vmem:[#allocation3 + $0x228] ss:$16 sps:$4 sm:$0xff]  }
  0x3f   :  { %v2889_v12 = vld [vmem:[#allocation3 + $0x244] ss:$16 sps:$4 sm:$0xff]   ;;  %v2892_v13 = vld [vmem:[#allocation3 + $0x24c] ss:$16 sps:$4 sm:$0xff]   ;;  %v2887_v14 = vld [vmem:[#allocation3 + $0x240] ss:$16 sps:$4 sm:$0xff]  }
  0x40   :  { %1675 = vmatpush1.bf16.msra.mxu0 %v2819_v26  ;;  %1847 = vmatpush1.bf16.msra.mxu1 %v2820_v27  ;;  %v2890_v15 = vld [vmem:[#allocation3 + $0x248] ss:$16 sps:$4 sm:$0xff]   ;;  %v2895_v16 = vld [vmem:[#allocation3 + $0x264] ss:$16 sps:$4 sm:$0xff]   ;;  %v2898_v17 = vld [vmem:[#allocation3 + $0x26c] ss:$16 sps:$4 sm:$0xff]  }
  0x41   :  { %1676 = vmatprep.subr.bf16.mxu0 %v2821_v28  ;;  %1848 = vmatprep.subr.bf16.mxu1 %v2823_v29  ;;  %v2893_v18 = vld [vmem:[#allocation3 + $0x260] ss:$16 sps:$4 sm:$0xff]   ;;  %v2896_v19 = vld [vmem:[#allocation3 + $0x268] ss:$16 sps:$4 sm:$0xff]   ;;  %v2901_v20 = vld [vmem:[#allocation3 + $0x284] ss:$16 sps:$4 sm:$0xff]  }
  0x42   :  { %v2904_v21 = vld [vmem:[#allocation3 + $0x28c] ss:$16 sps:$4 sm:$0xff]   ;;  %v2899_v22 = vld [vmem:[#allocation3 + $0x280] ss:$16 sps:$4 sm:$0xff]   ;;  %v2902_v23 = vld [vmem:[#allocation3 + $0x288] ss:$16 sps:$4 sm:$0xff]  }
  0x43   :  { %v2907_v24 = vld [vmem:[#allocation3 + $0x2a4] ss:$16 sps:$4 sm:$0xff]   ;;  %v2910_v25 = vld [vmem:[#allocation3 + $0x2ac] ss:$16 sps:$4 sm:$0xff]   ;;  %v2905_v26 = vld [vmem:[#allocation3 + $0x2a0] ss:$16 sps:$4 sm:$0xff]  }
  0x44   :  { %1677 = vmatpush1.bf16.msra.mxu0 %v2825_v30  ;;  %1849 = vmatpush1.bf16.msra.mxu1 %v2826_v31  ;;  %v2908_v27 = vld [vmem:[#allocation3 + $0x2a8] ss:$16 sps:$4 sm:$0xff]   ;;  %v2913_v28 = vld [vmem:[#allocation3 + $0x2c4] ss:$16 sps:$4 sm:$0xff]   ;;  %v2916_v29 = vld [vmem:[#allocation3 + $0x2cc] ss:$16 sps:$4 sm:$0xff]  }
  0x45   :  { %1678 = vmatprep.subr.bf16.mxu0 %v2827_v32  ;;  %1850 = vmatprep.subr.bf16.mxu1 %v2829_v33  ;;  %v3330_v30 = vld [vmem:[%s3399_s0 + $0x8] sm:$0xff]  ;;  %v2911_v32 = vld [vmem:[#allocation3 + $0x2c0] ss:$16 sps:$4 sm:$0xff]   ;;  %v2937_v47 = vld [vmem:[#allocation3 + $0x344] ss:$16 sps:$4 sm:$0xff]  }
  0x46   :  { %v3335_v31 = vld [vmem:[%s3399_s0 + $0x28] sm:$0xff] }
  0x47   :  { %v2914_v33 = vld [vmem:[#allocation3 + $0x2c8] ss:$16 sps:$4 sm:$0xff]  }
  0x48   :  { %1679 = vmatpush1.bf16.msra.mxu0 %v2831_v34  ;;  %1851 = vmatpush1.bf16.msra.mxu1 %v2832_v35  ;;  %v2402_v34 = vcombine.high %v3330_v30, %v3335_v31  ;;  %v2919_v35 = vld [vmem:[#allocation3 + $0x2e4] ss:$16 sps:$4 sm:$0xff]   ;;  %v2932_v46 = vld [vmem:[#allocation3 + $0x328] ss:$16 sps:$4 sm:$0xff]  }
  0x49   :  { %1680 = vmatprep.subr.bf16.mxu0 %v2833_v36  ;;  %1852 = vmatprep.subr.bf16.mxu1 %v2835_v37  ;;  %v2922_v36 = vld [vmem:[#allocation3 + $0x2ec] ss:$16 sps:$4 sm:$0xff]   ;;  %v2917_v37 = vld [vmem:[#allocation3 + $0x2e0] ss:$16 sps:$4 sm:$0xff]   ;;  %v2938_v50 = vld [vmem:[#allocation3 + $0x348] ss:$16 sps:$4 sm:$0xff]  }
  0x4c   :  { %1681 = vmatpush1.bf16.msra.mxu0 %v2837_v38  ;;  %1853 = vmatpush1.bf16.msra.mxu1 %v2838_v39  ;;  %v2920_v38 = vld [vmem:[#allocation3 + $0x2e8] ss:$16 sps:$4 sm:$0xff]   ;;  %v2925_v39 = vld [vmem:[#allocation3 + $0x304] ss:$16 sps:$4 sm:$0xff]  }
  0x4d   :  { %1682 = vmatprep.subr.bf16.mxu0 %v2839_v40  ;;  %1854 = vmatprep.subr.bf16.mxu1 %v2841_v41  ;;  %v2928_v40 = vld [vmem:[#allocation3 + $0x30c] ss:$16 sps:$4 sm:$0xff]   ;;  %v2923_v41 = vld [vmem:[#allocation3 + $0x300] ss:$16 sps:$4 sm:$0xff]  }
  0x50   :  { %1683 = vmatpush1.bf16.msra.mxu0 %v2843_v42  ;;  %1855 = vmatpush1.bf16.msra.mxu1 %v2844_v43  ;;  %v2926_v42 = vld [vmem:[#allocation3 + $0x308] ss:$16 sps:$4 sm:$0xff]   ;;  %v2931_v43 = vld [vmem:[#allocation3 + $0x324] ss:$16 sps:$4 sm:$0xff]  }
  0x51   :  { %1684 = vmatprep.subr.bf16.mxu0 %v2845_v44  ;;  %1856 = vmatprep.subr.bf16.mxu1 %v2847_v45  ;;  %v2934_v44 = vld [vmem:[#allocation3 + $0x32c] ss:$16 sps:$4 sm:$0xff]   ;;  %v2929_v45 = vld [vmem:[#allocation3 + $0x320] ss:$16 sps:$4 sm:$0xff]  }
  0x54   :  { %1685 = vmatpush1.bf16.msra.mxu0 %v2849_v48  ;;  %1857 = vmatpush1.bf16.msra.mxu1 %v2850_v49  ;;  %v2940_v48 = vld [vmem:[#allocation3 + $0x34c] ss:$16 sps:$4 sm:$0xff]   ;;  %v2935_v49 = vld [vmem:[#allocation3 + $0x340] ss:$16 sps:$4 sm:$0xff]  }
  0x55   :  { %1686 = vmatprep.subr.bf16.mxu0 %v2851_v51  ;;  %1858 = vmatprep.subr.bf16.mxu1 %v2853_v52  ;;  %v2943_v51 = vld [vmem:[#allocation3 + $0x364] ss:$16 sps:$4 sm:$0xff]   ;;  %v2946_v52 = vld [vmem:[#allocation3 + $0x36c] ss:$16 sps:$4 sm:$0xff]  }
  0x58   :  { %1687 = vmatpush1.bf16.msra.mxu0 %v2855_v53  ;;  %1859 = vmatpush1.bf16.msra.mxu1 %v2856_v54  ;;  %v2941_v53 = vld [vmem:[#allocation3 + $0x360] ss:$16 sps:$4 sm:$0xff]   ;;  %v2944_v54 = vld [vmem:[#allocation3 + $0x368] ss:$16 sps:$4 sm:$0xff]  }
  0x59   :  { %1688 = vmatprep.subr.bf16.mxu0 %v2857_v55  ;;  %1860 = vmatprep.subr.bf16.mxu1 %v2859_v56  ;;  %v2949_v55 = vld [vmem:[#allocation3 + $0x384] ss:$16 sps:$4 sm:$0xff]   ;;  %v2952_v56 = vld [vmem:[#allocation3 + $0x38c] ss:$16 sps:$4 sm:$0xff]  }
  0x5c   :  { %1689 = vmatpush1.bf16.msra.mxu0 %v2861_v57  ;;  %1861 = vmatpush1.bf16.msra.mxu1 %v2862_v58  ;;  %v2947_v57 = vld [vmem:[#allocation3 + $0x380] ss:$16 sps:$4 sm:$0xff]   ;;  %v2950_v58 = vld [vmem:[#allocation3 + $0x388] ss:$16 sps:$4 sm:$0xff]  }
  0x5d   :  { %1690 = vmatprep.subr.bf16.mxu0 %v2863_v59  ;;  %1862 = vmatprep.subr.bf16.mxu1 %v2865_v60  ;;  %v2955_v59 = vld [vmem:[#allocation3 + $0x3a4] ss:$16 sps:$4 sm:$0xff]   ;;  %v2958_v60 = vld [vmem:[#allocation3 + $0x3ac] ss:$16 sps:$4 sm:$0xff]  }
  0x60   :  { %1691 = vmatpush1.bf16.msra.mxu0 %v2867_v61  ;;  %1863 = vmatpush1.bf16.msra.mxu1 %v2868_v62  ;;  %v2953_v61 = vld [vmem:[#allocation3 + $0x3a0] ss:$16 sps:$4 sm:$0xff]   ;;  %v2956_v62 = vld [vmem:[#allocation3 + $0x3a8] ss:$16 sps:$4 sm:$0xff]  }
  0x61   :  { %1692 = vmatprep.subr.bf16.mxu0 %v2869_v63  ;;  %1864 = vmatprep.subr.bf16.mxu1 %v2871_v0  ;;  %v2961_v63 = vld [vmem:[#allocation3 + $0x3c4] ss:$16 sps:$4 sm:$0xff]   ;;  %v2964_v0 = vld [vmem:[#allocation3 + $0x3cc] ss:$16 sps:$4 sm:$0xff]  }
  0x64   :  { %1693 = vmatpush1.bf16.msra.mxu0 %v2873_v1  ;;  %1865 = vmatpush1.bf16.msra.mxu1 %v2874_v2  ;;  %v2959_v1 = vld [vmem:[#allocation3 + $0x3c0] ss:$16 sps:$4 sm:$0xff]   ;;  %v2962_v2 = vld [vmem:[#allocation3 + $0x3c8] ss:$16 sps:$4 sm:$0xff]  }
  0x65   :  { %1705 = vmatprep.subr.bf16.mxu0 %v2877_v3  ;;  %1877 = vmatprep.subr.bf16.mxu1 %v2880_v4  ;;  %v2967_v3 = vld [vmem:[#allocation3 + $0x3e4] ss:$16 sps:$4 sm:$0xff]   ;;  %v2970_v4 = vld [vmem:[#allocation3 + $0x3ec] ss:$16 sps:$4 sm:$0xff]  }
  0x67   :  { %1695 = vmatmul.mubr.bf16.vlgmr.msra.gmra.mrb[0].mxu0 %v2399_v5  ;;  %1867 = vmatmul.mubr.bf16.vlgmr.msra.gmra.mrb[0].mxu1 %v2399_v5  ;;  %v2965_v5 = vld [vmem:[#allocation3 + $0x3e0] ss:$16 sps:$4 sm:$0xff]  }
  0x68   :  { %1706 = vmatpush1.bf16.msra.mxu0 %v2875_v6  ;;  %1878 = vmatpush1.bf16.msra.mxu1 %v2878_v7  ;;  %v2968_v6 = vld [vmem:[#allocation3 + $0x3e8] ss:$16 sps:$4 sm:$0xff]   ;;  %v2973_v7 = vld [vmem:[#allocation3 + $0x404] ss:$16 sps:$4 sm:$0xff]  }
  0x69   :  { %1707 = vmatprep.subr.bf16.mxu0 %v2883_v8  ;;  %1879 = vmatprep.subr.bf16.mxu1 %v2886_v9  ;;  %v2976_v8 = vld [vmem:[#allocation3 + $0x40c] ss:$16 sps:$4 sm:$0xff]   ;;  %v2971_v9 = vld [vmem:[#allocation3 + $0x400] ss:$16 sps:$4 sm:$0xff]  }
  0x6a   :  { %1737 = vmatprep.mubr.bf16.mxu0 %v2402_v34  ;;  %1909 = vmatprep.mubr.bf16.mxu1 %v2402_v34  ;;  %v3004_v34 = vld [vmem:[#allocation3 + $0x4a8] ss:$16 sps:$4 sm:$0xff]  }
  0x6c   :  { %1708 = vmatpush1.bf16.msra.mxu0 %v2881_v10  ;;  %1880 = vmatpush1.bf16.msra.mxu1 %v2884_v11  ;;  %v2974_v10 = vld [vmem:[#allocation3 + $0x408] ss:$16 sps:$4 sm:$0xff]   ;;  %v2401_v11 = vcombine.low %v3330_v30, %v3335_v31  ;;  %v3003_v31 = vld [vmem:[#allocation3 + $0x4a4] ss:$16 sps:$4 sm:$0xff]  }
  0x6d   :  { %1709 = vmatprep.subr.bf16.mxu0 %v2889_v12  ;;  %1881 = vmatprep.subr.bf16.mxu1 %v2892_v13  ;;  %v2979_v12 = vld [vmem:[#allocation3 + $0x424] ss:$16 sps:$4 sm:$0xff]   ;;  %v2982_v13 = vld [vmem:[#allocation3 + $0x42c] ss:$16 sps:$4 sm:$0xff]   ;;  %v2998_v30 = vld [vmem:[#allocation3 + $0x488] ss:$16 sps:$4 sm:$0xff]  }
  0x70   :  { %1710 = vmatpush1.bf16.msra.mxu0 %v2887_v14  ;;  %1882 = vmatpush1.bf16.msra.mxu1 %v2890_v15  ;;  %v3344_v14 = vld [vmem:[%s3399_s0 + $0x10] sm:$0xff] }
  0x71   :  { %1711 = vmatprep.subr.bf16.mxu0 %v2895_v16  ;;  %1883 = vmatprep.subr.bf16.mxu1 %v2898_v17  ;;  %v3349_v15 = vld [vmem:[%s3399_s0 + $0x30] sm:$0xff] }
  0x72   :  { %v2404_v16 = vcombine.high %v3344_v14, %v3349_v15  ;;  %v2977_v17 = vld [vmem:[#allocation3 + $0x420] ss:$16 sps:$4 sm:$0xff]  }
  0x74   :  { %1712 = vmatpush1.bf16.msra.mxu0 %v2893_v18  ;;  %1884 = vmatpush1.bf16.msra.mxu1 %v2896_v19  ;;  %v2980_v18 = vld [vmem:[#allocation3 + $0x428] ss:$16 sps:$4 sm:$0xff]   ;;  %v2985_v19 = vld [vmem:[#allocation3 + $0x444] ss:$16 sps:$4 sm:$0xff]  }
  0x75   :  { %1713 = vmatprep.subr.bf16.mxu0 %v2901_v20  ;;  %1885 = vmatprep.subr.bf16.mxu1 %v2904_v21  ;;  %v2988_v20 = vld [vmem:[#allocation3 + $0x44c] ss:$16 sps:$4 sm:$0xff]   ;;  %v2983_v21 = vld [vmem:[#allocation3 + $0x440] ss:$16 sps:$4 sm:$0xff]  }
  0x78   :  { %1714 = vmatpush1.bf16.msra.mxu0 %v2899_v22  ;;  %1886 = vmatpush1.bf16.msra.mxu1 %v2902_v23  ;;  %v2986_v22 = vld [vmem:[#allocation3 + $0x448] ss:$16 sps:$4 sm:$0xff]   ;;  %v2991_v23 = vld [vmem:[#allocation3 + $0x464] ss:$16 sps:$4 sm:$0xff]  }
  0x79   :  { %1715 = vmatprep.subr.bf16.mxu0 %v2907_v24  ;;  %1887 = vmatprep.subr.bf16.mxu1 %v2910_v25  ;;  %v2994_v24 = vld [vmem:[#allocation3 + $0x46c] ss:$16 sps:$4 sm:$0xff]   ;;  %v2989_v25 = vld [vmem:[#allocation3 + $0x460] ss:$16 sps:$4 sm:$0xff]  }
  0x7c   :  { %1716 = vmatpush1.bf16.msra.mxu0 %v2905_v26  ;;  %1888 = vmatpush1.bf16.msra.mxu1 %v2908_v27  ;;  %v2992_v26 = vld [vmem:[#allocation3 + $0x468] ss:$16 sps:$4 sm:$0xff]   ;;  %v2997_v27 = vld [vmem:[#allocation3 + $0x484] ss:$16 sps:$4 sm:$0xff]  }
  0x7d   :  { %1717 = vmatprep.subr.bf16.mxu0 %v2913_v28  ;;  %1889 = vmatprep.subr.bf16.mxu1 %v2916_v29  ;;  %v3000_v28 = vld [vmem:[#allocation3 + $0x48c] ss:$16 sps:$4 sm:$0xff]   ;;  %v2995_v29 = vld [vmem:[#allocation3 + $0x480] ss:$16 sps:$4 sm:$0xff]  }
  0x80   :  { %1718 = vmatpush1.bf16.msra.mxu0 %v2911_v32  ;;  %1890 = vmatpush1.bf16.msra.mxu1 %v2914_v33  ;;  %v3006_v32 = vld [vmem:[#allocation3 + $0x4ac] ss:$16 sps:$4 sm:$0xff]   ;;  %v3001_v33 = vld [vmem:[#allocation3 + $0x4a0] ss:$16 sps:$4 sm:$0xff]  }
  0x81   :  { %1719 = vmatprep.subr.bf16.mxu0 %v2919_v35  ;;  %1891 = vmatprep.subr.bf16.mxu1 %v2922_v36  ;;  %v3009_v35 = vld [vmem:[#allocation3 + $0x4c4] ss:$16 sps:$4 sm:$0xff]   ;;  %v3012_v36 = vld [vmem:[#allocation3 + $0x4cc] ss:$16 sps:$4 sm:$0xff]  }
  0x84   :  { %1720 = vmatpush1.bf16.msra.mxu0 %v2917_v37  ;;  %1892 = vmatpush1.bf16.msra.mxu1 %v2920_v38  ;;  %v3007_v37 = vld [vmem:[#allocation3 + $0x4c0] ss:$16 sps:$4 sm:$0xff]   ;;  %v3010_v38 = vld [vmem:[#allocation3 + $0x4c8] ss:$16 sps:$4 sm:$0xff]  }
  0x85   :  { %1721 = vmatprep.subr.bf16.mxu0 %v2925_v39  ;;  %1893 = vmatprep.subr.bf16.mxu1 %v2928_v40  ;;  %v3015_v39 = vld [vmem:[#allocation3 + $0x4e4] ss:$16 sps:$4 sm:$0xff]   ;;  %v3018_v40 = vld [vmem:[#allocation3 + $0x4ec] ss:$16 sps:$4 sm:$0xff]  }
  0x88   :  { %1722 = vmatpush1.bf16.msra.mxu0 %v2923_v41  ;;  %1894 = vmatpush1.bf16.msra.mxu1 %v2926_v42  ;;  %v3013_v41 = vld [vmem:[#allocation3 + $0x4e0] ss:$16 sps:$4 sm:$0xff]   ;;  %v3016_v42 = vld [vmem:[#allocation3 + $0x4e8] ss:$16 sps:$4 sm:$0xff]  }
  0x89   :  { %1723 = vmatprep.subr.bf16.mxu0 %v2931_v43  ;;  %1895 = vmatprep.subr.bf16.mxu1 %v2934_v44  ;;  %v3021_v43 = vld [vmem:[#allocation3 + $0x504] ss:$16 sps:$4 sm:$0xff]   ;;  %v3024_v44 = vld [vmem:[#allocation3 + $0x50c] ss:$16 sps:$4 sm:$0xff]  }
  0x8c   :  { %1724 = vmatpush1.bf16.msra.mxu0 %v2929_v45  ;;  %1896 = vmatpush1.bf16.msra.mxu1 %v2932_v46  ;;  %v3019_v45 = vld [vmem:[#allocation3 + $0x500] ss:$16 sps:$4 sm:$0xff]   ;;  %v3022_v46 = vld [vmem:[#allocation3 + $0x508] ss:$16 sps:$4 sm:$0xff]  }
  0x8d   :  { %1725 = vmatprep.subr.bf16.mxu0 %v2937_v47  ;;  %1897 = vmatprep.subr.bf16.mxu1 %v2940_v48  ;;  %v3027_v47 = vld [vmem:[#allocation3 + $0x524] ss:$16 sps:$4 sm:$0xff]   ;;  %v3030_v48 = vld [vmem:[#allocation3 + $0x52c] ss:$16 sps:$4 sm:$0xff]  }
  0x90   :  { %1726 = vmatpush1.bf16.msra.mxu0 %v2935_v49  ;;  %1898 = vmatpush1.bf16.msra.mxu1 %v2938_v50  ;;  %v3025_v49 = vld [vmem:[#allocation3 + $0x520] ss:$16 sps:$4 sm:$0xff]   ;;  %v3028_v50 = vld [vmem:[#allocation3 + $0x528] ss:$16 sps:$4 sm:$0xff]  }
  0x91   :  { %1727 = vmatprep.subr.bf16.mxu0 %v2943_v51  ;;  %1899 = vmatprep.subr.bf16.mxu1 %v2946_v52  ;;  %v3033_v51 = vld [vmem:[#allocation3 + $0x544] ss:$16 sps:$4 sm:$0xff]   ;;  %v3036_v52 = vld [vmem:[#allocation3 + $0x54c] ss:$16 sps:$4 sm:$0xff]  }
  0x94   :  { %1728 = vmatpush1.bf16.msra.mxu0 %v2941_v53  ;;  %1900 = vmatpush1.bf16.msra.mxu1 %v2944_v54  ;;  %v3031_v53 = vld [vmem:[#allocation3 + $0x540] ss:$16 sps:$4 sm:$0xff]   ;;  %v3034_v54 = vld [vmem:[#allocation3 + $0x548] ss:$16 sps:$4 sm:$0xff]  }
  0x95   :  { %1729 = vmatprep.subr.bf16.mxu0 %v2949_v55  ;;  %1901 = vmatprep.subr.bf16.mxu1 %v2952_v56  ;;  %v3039_v55 = vld [vmem:[#allocation3 + $0x564] ss:$16 sps:$4 sm:$0xff]   ;;  %v3042_v56 = vld [vmem:[#allocation3 + $0x56c] ss:$16 sps:$4 sm:$0xff]  }
  0x98   :  { %1730 = vmatpush1.bf16.msra.mxu0 %v2947_v57  ;;  %1902 = vmatpush1.bf16.msra.mxu1 %v2950_v58  ;;  %v3037_v57 = vld [vmem:[#allocation3 + $0x560] ss:$16 sps:$4 sm:$0xff]   ;;  %v3040_v58 = vld [vmem:[#allocation3 + $0x568] ss:$16 sps:$4 sm:$0xff]  }
  0x99   :  { %1731 = vmatprep.subr.bf16.mxu0 %v2955_v59  ;;  %1903 = vmatprep.subr.bf16.mxu1 %v2958_v60  ;;  %v3045_v59 = vld [vmem:[#allocation3 + $0x584] ss:$16 sps:$4 sm:$0xff]   ;;  %v3048_v60 = vld [vmem:[#allocation3 + $0x58c] ss:$16 sps:$4 sm:$0xff]  }
  0x9c   :  { %1732 = vmatpush1.bf16.msra.mxu0 %v2953_v61  ;;  %1904 = vmatpush1.bf16.msra.mxu1 %v2956_v62  ;;  %v3043_v61 = vld [vmem:[#allocation3 + $0x580] ss:$16 sps:$4 sm:$0xff]   ;;  %v3046_v62 = vld [vmem:[#allocation3 + $0x588] ss:$16 sps:$4 sm:$0xff]  }
  0x9d   :  { %1733 = vmatprep.subr.bf16.mxu0 %v2961_v63  ;;  %1905 = vmatprep.subr.bf16.mxu1 %v2964_v0  ;;  %v3051_v63 = vld [vmem:[#allocation3 + $0x5a4] ss:$16 sps:$4 sm:$0xff]   ;;  %v3054_v0 = vld [vmem:[#allocation3 + $0x5ac] ss:$16 sps:$4 sm:$0xff]  }
  0xa0   :  { %1734 = vmatpush1.bf16.msra.mxu0 %v2959_v1  ;;  %1906 = vmatpush1.bf16.msra.mxu1 %v2962_v2  ;;  %v3049_v1 = vld [vmem:[#allocation3 + $0x5a0] ss:$16 sps:$4 sm:$0xff]   ;;  %v3052_v2 = vld [vmem:[#allocation3 + $0x5a8] ss:$16 sps:$4 sm:$0xff]  }
  0xa1   :  { %1735 = vmatprep.subr.bf16.mxu0 %v2967_v3  ;;  %1907 = vmatprep.subr.bf16.mxu1 %v2970_v4  ;;  %v3057_v3 = vld [vmem:[#allocation3 + $0x5c4] ss:$16 sps:$4 sm:$0xff]   ;;  %v3060_v4 = vld [vmem:[#allocation3 + $0x5cc] ss:$16 sps:$4 sm:$0xff]  }
  0xa4   :  { %1736 = vmatpush1.bf16.msra.mxu0 %v2965_v5  ;;  %1908 = vmatpush1.bf16.msra.mxu1 %v2968_v6  ;;  %v3055_v5 = vld [vmem:[#allocation3 + $0x5c0] ss:$16 sps:$4 sm:$0xff]   ;;  %v3058_v6 = vld [vmem:[#allocation3 + $0x5c8] ss:$16 sps:$4 sm:$0xff]  }
  0xa5   :  { %1748 = vmatprep.subr.bf16.mxu0 %v2973_v7  ;;  %1920 = vmatprep.subr.bf16.mxu1 %v2976_v8  ;;  %v3063_v7 = vld [vmem:[#allocation3 + $0x5e4] ss:$16 sps:$4 sm:$0xff]   ;;  %v3066_v8 = vld [vmem:[#allocation3 + $0x5ec] ss:$16 sps:$4 sm:$0xff]  }
  0xa7   :  { %1738 = vmatmul.mubr.bf16.vlgmr.msra.gmra.mrb[0].mxu0 %v2401_v11  ;;  %1910 = vmatmul.mubr.bf16.vlgmr.msra.gmra.mrb[0].mxu1 %v2401_v11  ;;  %v3069_v11 = vld [vmem:[#allocation3 + $0x604] ss:$16 sps:$4 sm:$0xff]  }
  0xa8   :  { %1749 = vmatpush1.bf16.msra.mxu0 %v2971_v9  ;;  %1921 = vmatpush1.bf16.msra.mxu1 %v2974_v10  ;;  %v3061_v9 = vld [vmem:[#allocation3 + $0x5e0] ss:$16 sps:$4 sm:$0xff]   ;;  %v3064_v10 = vld [vmem:[#allocation3 + $0x5e8] ss:$16 sps:$4 sm:$0xff]  }
  0xa9   :  { %1750 = vmatprep.subr.bf16.mxu0 %v2979_v12  ;;  %1922 = vmatprep.subr.bf16.mxu1 %v2982_v13  ;;  %v3072_v12 = vld [vmem:[#allocation3 + $0x60c] ss:$16 sps:$4 sm:$0xff]   ;;  %v3067_v13 = vld [vmem:[#allocation3 + $0x600] ss:$16 sps:$4 sm:$0xff]  }
  0xaa   :  { %1780 = vmatprep.mubr.bf16.mxu0 %v2404_v16  ;;  %1952 = vmatprep.mubr.bf16.mxu1 %v2404_v16  ;;  %v3070_v16 = vld [vmem:[#allocation3 + $0x608] ss:$16 sps:$4 sm:$0xff]  }
  0xac   :  { %1751 = vmatpush1.bf16.msra.mxu0 %v2977_v17  ;;  %1923 = vmatpush1.bf16.msra.mxu1 %v2980_v18  ;;  %v3356_v17 = vld [vmem:[%s3399_s0 + $0x18] sm:$0xff]  ;;  %v2403_v18 = vcombine.low %v3344_v14, %v3349_v15  ;;  %v3079_v15 = vld [vmem:[#allocation3 + $0x640] ss:$16 sps:$4 sm:$0xff]  }
  0xad   :  { %1752 = vmatprep.subr.bf16.mxu0 %v2985_v19  ;;  %1924 = vmatprep.subr.bf16.mxu1 %v2988_v20  ;;  %v3363_v19 = vld [vmem:[%s3399_s0 + $0x38] sm:$0xff]  ;;  %v3075_v20 = vld [vmem:[#allocation3 + $0x624] ss:$16 sps:$4 sm:$0xff]  }
  0xae   :  { %v3084_v14 = vld [vmem:[#allocation3 + $0x64c] ss:$16 sps:$4 sm:$0xff]  }
  0xb0   :  { %1753 = vmatpush1.bf16.msra.mxu0 %v2983_v21  ;;  %1925 = vmatpush1.bf16.msra.mxu1 %v2986_v22  ;;  %v3078_v21 = vld [vmem:[#allocation3 + $0x62c] ss:$16 sps:$4 sm:$0xff]   ;;  %v3073_v22 = vld [vmem:[#allocation3 + $0x620] ss:$16 sps:$4 sm:$0xff]  }
  0xb1   :  { %1754 = vmatprep.subr.bf16.mxu0 %v2991_v23  ;;  %1926 = vmatprep.subr.bf16.mxu1 %v2994_v24  ;;  %v3076_v23 = vld [vmem:[#allocation3 + $0x628] ss:$16 sps:$4 sm:$0xff]   ;;  %v2406_v24 = vcombine.high %v3356_v17, %v3363_v19 }
  0xb4   :  { %1755 = vmatpush1.bf16.msra.mxu0 %v2989_v25  ;;  %1927 = vmatpush1.bf16.msra.mxu1 %v2992_v26  ;;  %v3081_v25 = vld [vmem:[#allocation3 + $0x644] ss:$16 sps:$4 sm:$0xff]   ;;  %v3082_v26 = vld [vmem:[#allocation3 + $0x648] ss:$16 sps:$4 sm:$0xff]  }
  0xb5   :  { %1756 = vmatprep.subr.bf16.mxu0 %v2997_v27  ;;  %1928 = vmatprep.subr.bf16.mxu1 %v3000_v28  ;;  %v3087_v27 = vld [vmem:[#allocation3 + $0x664] ss:$16 sps:$4 sm:$0xff]   ;;  %v3090_v28 = vld [vmem:[#allocation3 + $0x66c] ss:$16 sps:$4 sm:$0xff]  }
  0xb8   :  { %1757 = vmatpush1.bf16.msra.mxu0 %v2995_v29  ;;  %1929 = vmatpush1.bf16.msra.mxu1 %v2998_v30  ;;  %v3085_v29 = vld [vmem:[#allocation3 + $0x660] ss:$16 sps:$4 sm:$0xff]   ;;  %v3088_v30 = vld [vmem:[#allocation3 + $0x668] ss:$16 sps:$4 sm:$0xff]  }
  0xb9   :  { %1758 = vmatprep.subr.bf16.mxu0 %v3003_v31  ;;  %1930 = vmatprep.subr.bf16.mxu1 %v3006_v32  ;;  %v3093_v31 = vld [vmem:[#allocation3 + $0x684] ss:$16 sps:$4 sm:$0xff]   ;;  %v3096_v32 = vld [vmem:[#allocation3 + $0x68c] ss:$16 sps:$4 sm:$0xff]  }
  0xbc   :  { %1759 = vmatpush1.bf16.msra.mxu0 %v3001_v33  ;;  %1931 = vmatpush1.bf16.msra.mxu1 %v3004_v34  ;;  %v3091_v33 = vld [vmem:[#allocation3 + $0x680] ss:$16 sps:$4 sm:$0xff]   ;;  %v3094_v34 = vld [vmem:[#allocation3 + $0x688] ss:$16 sps:$4 sm:$0xff]  }
  0xbd   :  { %1760 = vmatprep.subr.bf16.mxu0 %v3009_v35  ;;  %1932 = vmatprep.subr.bf16.mxu1 %v3012_v36  ;;  %v3099_v35 = vld [vmem:[#allocation3 + $0x6a4] ss:$16 sps:$4 sm:$0xff]   ;;  %v3102_v36 = vld [vmem:[#allocation3 + $0x6ac] ss:$16 sps:$4 sm:$0xff]  }
  0xc0   :  { %1761 = vmatpush1.bf16.msra.mxu0 %v3007_v37  ;;  %1933 = vmatpush1.bf16.msra.mxu1 %v3010_v38  ;;  %v3097_v37 = vld [vmem:[#allocation3 + $0x6a0] ss:$16 sps:$4 sm:$0xff]   ;;  %v3100_v38 = vld [vmem:[#allocation3 + $0x6a8] ss:$16 sps:$4 sm:$0xff]  }
  0xc1   :  { %1762 = vmatprep.subr.bf16.mxu0 %v3015_v39  ;;  %1934 = vmatprep.subr.bf16.mxu1 %v3018_v40  ;;  %v3105_v39 = vld [vmem:[#allocation3 + $0x6c4] ss:$16 sps:$4 sm:$0xff]   ;;  %v3108_v40 = vld [vmem:[#allocation3 + $0x6cc] ss:$16 sps:$4 sm:$0xff]  }
  0xc4   :  { %1763 = vmatpush1.bf16.msra.mxu0 %v3013_v41  ;;  %1935 = vmatpush1.bf16.msra.mxu1 %v3016_v42  ;;  %v3103_v41 = vld [vmem:[#allocation3 + $0x6c0] ss:$16 sps:$4 sm:$0xff]   ;;  %v3106_v42 = vld [vmem:[#allocation3 + $0x6c8] ss:$16 sps:$4 sm:$0xff]  }
  0xc5   :  { %1764 = vmatprep.subr.bf16.mxu0 %v3021_v43  ;;  %1936 = vmatprep.subr.bf16.mxu1 %v3024_v44  ;;  %v3111_v43 = vld [vmem:[#allocation3 + $0x6e4] ss:$16 sps:$4 sm:$0xff]   ;;  %v3114_v44 = vld [vmem:[#allocation3 + $0x6ec] ss:$16 sps:$4 sm:$0xff]  }
  0xc8   :  { %1765 = vmatpush1.bf16.msra.mxu0 %v3019_v45  ;;  %1937 = vmatpush1.bf16.msra.mxu1 %v3022_v46  ;;  %v3109_v45 = vld [vmem:[#allocation3 + $0x6e0] ss:$16 sps:$4 sm:$0xff]   ;;  %v3112_v46 = vld [vmem:[#allocation3 + $0x6e8] ss:$16 sps:$4 sm:$0xff]  }
  0xc9   :  { %1766 = vmatprep.subr.bf16.mxu0 %v3027_v47  ;;  %1938 = vmatprep.subr.bf16.mxu1 %v3030_v48  ;;  %v3117_v47 = vld [vmem:[#allocation3 + $0x704] ss:$16 sps:$4 sm:$0xff]   ;;  %v3120_v48 = vld [vmem:[#allocation3 + $0x70c] ss:$16 sps:$4 sm:$0xff]  }
  0xcc   :  { %1767 = vmatpush1.bf16.msra.mxu0 %v3025_v49  ;;  %1939 = vmatpush1.bf16.msra.mxu1 %v3028_v50  ;;  %v3115_v49 = vld [vmem:[#allocation3 + $0x700] ss:$16 sps:$4 sm:$0xff]   ;;  %v3118_v50 = vld [vmem:[#allocation3 + $0x708] ss:$16 sps:$4 sm:$0xff]  }
  0xcd   :  { %1768 = vmatprep.subr.bf16.mxu0 %v3033_v51  ;;  %1940 = vmatprep.subr.bf16.mxu1 %v3036_v52  ;;  %v3123_v51 = vld [vmem:[#allocation3 + $0x724] ss:$16 sps:$4 sm:$0xff]   ;;  %v3126_v52 = vld [vmem:[#allocation3 + $0x72c] ss:$16 sps:$4 sm:$0xff]  }
  0xd0   :  { %1769 = vmatpush1.bf16.msra.mxu0 %v3031_v53  ;;  %1941 = vmatpush1.bf16.msra.mxu1 %v3034_v54  ;;  %v3121_v53 = vld [vmem:[#allocation3 + $0x720] ss:$16 sps:$4 sm:$0xff]   ;;  %v3124_v54 = vld [vmem:[#allocation3 + $0x728] ss:$16 sps:$4 sm:$0xff]  }
  0xd1   :  { %1770 = vmatprep.subr.bf16.mxu0 %v3039_v55  ;;  %1942 = vmatprep.subr.bf16.mxu1 %v3042_v56  ;;  %v3129_v55 = vld [vmem:[#allocation3 + $0x744] ss:$16 sps:$4 sm:$0xff]   ;;  %v3132_v56 = vld [vmem:[#allocation3 + $0x74c] ss:$16 sps:$4 sm:$0xff]  }
  0xd4   :  { %1771 = vmatpush1.bf16.msra.mxu0 %v3037_v57  ;;  %1943 = vmatpush1.bf16.msra.mxu1 %v3040_v58  ;;  %v3127_v57 = vld [vmem:[#allocation3 + $0x740] ss:$16 sps:$4 sm:$0xff]   ;;  %v3130_v58 = vld [vmem:[#allocation3 + $0x748] ss:$16 sps:$4 sm:$0xff]  }
  0xd5   :  { %1772 = vmatprep.subr.bf16.mxu0 %v3045_v59  ;;  %1944 = vmatprep.subr.bf16.mxu1 %v3048_v60  ;;  %v3135_v59 = vld [vmem:[#allocation3 + $0x764] ss:$16 sps:$4 sm:$0xff]   ;;  %v3138_v60 = vld [vmem:[#allocation3 + $0x76c] ss:$16 sps:$4 sm:$0xff]  }
  0xd8   :  { %1773 = vmatpush1.bf16.msra.mxu0 %v3043_v61  ;;  %1945 = vmatpush1.bf16.msra.mxu1 %v3046_v62  ;;  %v3133_v61 = vld [vmem:[#allocation3 + $0x760] ss:$16 sps:$4 sm:$0xff]   ;;  %v3136_v62 = vld [vmem:[#allocation3 + $0x768] ss:$16 sps:$4 sm:$0xff]  }
  0xd9   :  { %1774 = vmatprep.subr.bf16.mxu0 %v3051_v63  ;;  %1946 = vmatprep.subr.bf16.mxu1 %v3054_v0  ;;  %v3141_v63 = vld [vmem:[#allocation3 + $0x784] ss:$16 sps:$4 sm:$0xff]   ;;  %v3144_v0 = vld [vmem:[#allocation3 + $0x78c] ss:$16 sps:$4 sm:$0xff]  }
  0xdc   :  { %1775 = vmatpush1.bf16.msra.mxu0 %v3049_v1  ;;  %1947 = vmatpush1.bf16.msra.mxu1 %v3052_v2  ;;  %v3139_v1 = vld [vmem:[#allocation3 + $0x780] ss:$16 sps:$4 sm:$0xff]   ;;  %v3142_v2 = vld [vmem:[#allocation3 + $0x788] ss:$16 sps:$4 sm:$0xff]  }
  0xdd   :  { %1776 = vmatprep.subr.bf16.mxu0 %v3057_v3  ;;  %1948 = vmatprep.subr.bf16.mxu1 %v3060_v4  ;;  %v3147_v3 = vld [vmem:[#allocation3 + $0x7a4] ss:$16 sps:$4 sm:$0xff]   ;;  %v3150_v4 = vld [vmem:[#allocation3 + $0x7ac] ss:$16 sps:$4 sm:$0xff]  }
  0xe0   :  { %1777 = vmatpush1.bf16.msra.mxu0 %v3055_v5  ;;  %1949 = vmatpush1.bf16.msra.mxu1 %v3058_v6  ;;  %v3145_v5 = vld [vmem:[#allocation3 + $0x7a0] ss:$16 sps:$4 sm:$0xff]   ;;  %v3148_v6 = vld [vmem:[#allocation3 + $0x7a8] ss:$16 sps:$4 sm:$0xff]  }
  0xe1   :  { %1778 = vmatprep.subr.bf16.mxu0 %v3063_v7  ;;  %1950 = vmatprep.subr.bf16.mxu1 %v3066_v8  ;;  %v3153_v7 = vld [vmem:[#allocation3 + $0x7c4] ss:$16 sps:$4 sm:$0xff]   ;;  %v3156_v8 = vld [vmem:[#allocation3 + $0x7cc] ss:$16 sps:$4 sm:$0xff]  }
  0xe4   :  { %1779 = vmatpush1.bf16.msra.mxu0 %v3061_v9  ;;  %1951 = vmatpush1.bf16.msra.mxu1 %v3064_v10  ;;  %v3151_v9 = vld [vmem:[#allocation3 + $0x7c0] ss:$16 sps:$4 sm:$0xff]   ;;  %v3154_v10 = vld [vmem:[#allocation3 + $0x7c8] ss:$16 sps:$4 sm:$0xff]  }
  0xe5   :  { %1791 = vmatprep.subr.bf16.mxu0 %v3069_v11  ;;  %1963 = vmatprep.subr.bf16.mxu1 %v3072_v12  ;;  %v3159_v11 = vld [vmem:[#allocation3 + $0x7e4] ss:$16 sps:$4 sm:$0xff]   ;;  %v3162_v12 = vld [vmem:[#allocation3 + $0x7ec] ss:$16 sps:$4 sm:$0xff]  }
  0xe7   :  { %1781 = vmatmul.mubr.bf16.vlgmr.msra.gmra.mrb[0].mxu0 %v2403_v18  ;;  %1953 = vmatmul.mubr.bf16.vlgmr.msra.gmra.mrb[0].mxu1 %v2403_v18  ;;  %v3163_v18 = vld [vmem:[#allocation5 + $0x40] sm:$0xff]  }
  0xe8   :  { %1792 = vmatpush1.bf16.msra.mxu0 %v3067_v13  ;;  %1964 = vmatpush1.bf16.msra.mxu1 %v3070_v16  ;;  %v3157_v13 = vld [vmem:[#allocation3 + $0x7e0] ss:$16 sps:$4 sm:$0xff]   ;;  %v3160_v16 = vld [vmem:[#allocation3 + $0x7e8] ss:$16 sps:$4 sm:$0xff]  }
  0xe9   :  { %1793 = vmatprep.subr.bf16.mxu0 %v3075_v20  ;;  %1965 = vmatprep.subr.bf16.mxu1 %v3078_v21  ;;  %v3164_v20 = vld [vmem:[#allocation5 + $0xc0] sm:$0xff]   ;;  %v2405_v21 = vcombine.low %v3356_v17, %v3363_v19  ;;  %v3173_v17 = vld [vmem:[#allocation5 + $0x10] sm:$0xff]  }
  0xea   :  { %1823 = vmatprep.mubr.bf16.mxu0 %v2406_v24  ;;  %1995 = vmatprep.mubr.bf16.mxu1 %v2406_v24  ;;  %v3167_v24 = vld [vmem:[#allocation5 + $0x48] sm:$0xff]   ;;  %v3174_v19 = vld [vmem:[#allocation5 + $0x90] sm:$0xff]  }
  0xec   :  { %1794 = vmatpush1.bf16.msra.mxu0 %v3073_v22  ;;  %1966 = vmatpush1.bf16.msra.mxu1 %v3076_v23  ;;  %v3165_v22 = vld [vmem:[#allocation5] sm:$0xff]  }
  0xed   :  { %1795 = vmatprep.subr.bf16.mxu0 %v3081_v25  ;;  %1967 = vmatprep.subr.bf16.mxu1 %v3084_v14  ;;  %v3166_v23 = vld [vmem:[#allocation5 + $0x80] sm:$0xff]   ;;  %v3168_v25 = vld [vmem:[#allocation5 + $0xc8] sm:$0xff]  }
  0xee   :  { %v3169_v14 = vld [vmem:[#allocation5 + $0x8] sm:$0xff]  }
  0xf0   :  { %1796 = vmatpush1.bf16.msra.mxu0 %v3079_v15  ;;  %1968 = vmatpush1.bf16.msra.mxu1 %v3082_v26  ;;  %v3170_v15 = vld [vmem:[#allocation5 + $0x88] sm:$0xff]   ;;  %v3171_v26 = vld [vmem:[#allocation5 + $0x50] sm:$0xff]  }
  0xf1   :  { %1797 = vmatprep.subr.bf16.mxu0 %v3087_v27  ;;  %1969 = vmatprep.subr.bf16.mxu1 %v3090_v28  ;;  %v3172_v27 = vld [vmem:[#allocation5 + $0xd0] sm:$0xff]   ;;  %v3175_v28 = vld [vmem:[#allocation5 + $0x58] sm:$0xff]  }
  0xf4   :  { %1798 = vmatpush1.bf16.msra.mxu0 %v3085_v29  ;;  %1970 = vmatpush1.bf16.msra.mxu1 %v3088_v30  ;;  %v3176_v29 = vld [vmem:[#allocation5 + $0xd8] sm:$0xff]  }
  0xf5   :  { %1799 = vmatprep.subr.bf16.mxu0 %v3093_v31  ;;  %1971 = vmatprep.subr.bf16.mxu1 %v3096_v32  ;;  %v3177_v30 = vld [vmem:[#allocation5 + $0x18] sm:$0xff]   ;;  %v3179_v32 = vld [vmem:[#allocation5 + $0x60] sm:$0xff]  }
  0xf6   :  { %v3178_v31 = vld [vmem:[#allocation5 + $0x98] sm:$0xff]  }
  0xf8   :  { %1800 = vmatpush1.bf16.msra.mxu0 %v3091_v33  ;;  %1972 = vmatpush1.bf16.msra.mxu1 %v3094_v34  ;;  %v3180_v33 = vld [vmem:[#allocation5 + $0xe0] sm:$0xff]  }
  0xf9   :  { %1801 = vmatprep.subr.bf16.mxu0 %v3099_v35  ;;  %1973 = vmatprep.subr.bf16.mxu1 %v3102_v36  ;;  %v3181_v34 = vld [vmem:[#allocation5 + $0x20] sm:$0xff]   ;;  %v3183_v36 = vld [vmem:[#allocation5 + $0x68] sm:$0xff]  }
  0xfa   :  { %v3182_v35 = vld [vmem:[#allocation5 + $0xa0] sm:$0xff]  }
  0xfc   :  { %1802 = vmatpush1.bf16.msra.mxu0 %v3097_v37  ;;  %1974 = vmatpush1.bf16.msra.mxu1 %v3100_v38  ;;  %v3184_v37 = vld [vmem:[#allocation5 + $0xe8] sm:$0xff]  }
  0xfd   :  { %1803 = vmatprep.subr.bf16.mxu0 %v3105_v39  ;;  %1975 = vmatprep.subr.bf16.mxu1 %v3108_v40  ;;  %v3185_v38 = vld [vmem:[#allocation5 + $0x28] sm:$0xff]   ;;  %v3187_v40 = vld [vmem:[#allocation5 + $0x70] sm:$0xff]  }
  0xfe   :  { %v3186_v39 = vld [vmem:[#allocation5 + $0xa8] sm:$0xff]  }
 0x100   :  { %1804 = vmatpush1.bf16.msra.mxu0 %v3103_v41  ;;  %1976 = vmatpush1.bf16.msra.mxu1 %v3106_v42  ;;  %v3188_v41 = vld [vmem:[#allocation5 + $0xf0] sm:$0xff]  }
 0x101   :  { %1805 = vmatprep.subr.bf16.mxu0 %v3111_v43  ;;  %1977 = vmatprep.subr.bf16.mxu1 %v3114_v44  ;;  %v3189_v42 = vld [vmem:[#allocation5 + $0x30] sm:$0xff]   ;;  %v3191_v44 = vld [vmem:[#allocation5 + $0x78] sm:$0xff]  }
 0x102   :  { %v3190_v43 = vld [vmem:[#allocation5 + $0xb0] sm:$0xff]  }
 0x104   :  { %1806 = vmatpush1.bf16.msra.mxu0 %v3109_v45  ;;  %1978 = vmatpush1.bf16.msra.mxu1 %v3112_v46  ;;  %v3192_v45 = vld [vmem:[#allocation5 + $0xf8] sm:$0xff]  }
 0x105   :  { %1807 = vmatprep.subr.bf16.mxu0 %v3117_v47  ;;  %1979 = vmatprep.subr.bf16.mxu1 %v3120_v48  ;;  %v3193_v46 = vld [vmem:[#allocation5 + $0x38] sm:$0xff]   ;;  %v322_v48 = vlaneseq }
 0x106   :  { %v3194_v47 = vld [vmem:[#allocation5 + $0xb8] sm:$0xff]  }
 0x108   :  { %1808 = vmatpush1.bf16.msra.mxu0 %v3115_v49  ;;  %1980 = vmatpush1.bf16.msra.mxu1 %v3118_v50  ;;  %v323_v49 = vshrl.u32 %v322_v48, 7 }
 0x109   :  { %1809 = vmatprep.subr.bf16.mxu0 %v3123_v51  ;;  %1981 = vmatprep.subr.bf16.mxu1 %v3126_v52  ;;  %v320_v52 = vld [vmem:[%s3401_s2] sm:$0xf] }
 0x10a   :  { %v324_v50 = vsub.s32 0, %v323_v49  ;;  %v332_v51 = vsub.s32 2, %v323_v49 }
 0x10c   :  { %1810 = vmatpush1.bf16.msra.mxu0 %v3121_v53  ;;  %1982 = vmatpush1.bf16.msra.mxu1 %v3124_v54  ;;  %v328_v53 = vsub.s32 1, %v323_v49  ;;  %v336_v54 = vsub.s32 3, %v323_v49 }
 0x10d   :  { %1811 = vmatprep.subr.bf16.mxu0 %v3129_v55  ;;  %1983 = vmatprep.subr.bf16.mxu1 %v3132_v56  ;;  %v325_v55 = vrot.slane %v320_v52, %v324_v50  ;;  %v333_v56 = vrot.slane %v320_v52, %v332_v51 }
 0x110   :  { %1812 = vmatpush1.bf16.msra.mxu0 %v3127_v57  ;;  %1984 = vmatpush1.bf16.msra.mxu1 %v3130_v58  ;;  %v329_v57 = vrot.slane %v320_v52, %v328_v53  ;;  %v337_v58 = vrot.slane %v320_v52, %v336_v54  ;;  %v2696_v52 = vld [vmem:[%s3404_s5] ss:$0 sm:$0xff] }
 0x111   :  { %1813 = vmatprep.subr.bf16.mxu0 %v3135_v59  ;;  %1985 = vmatprep.subr.bf16.mxu1 %v3138_v60  ;;  %v3199_v60 = vld [vmem:[%s3399_s0] sm:$0xff] }
 0x114   :  { %1814 = vmatpush1.bf16.msra.mxu0 %v3133_v61  ;;  %1986 = vmatpush1.bf16.msra.mxu1 %v3136_v62  ;;  %v2006_v61 = vunpack.c.l.bf16 %v3199_v60 }
 0x115   :  { %1815 = vmatprep.subr.bf16.mxu0 %v3141_v63  ;;  %1987 = vmatprep.subr.bf16.mxu1 %v3144_v0  ;;  %v3200_v63 = vld [vmem:[%s3399_s0 + $0x8] sm:$0xff] }
 0x116   :  { %v2008_v0 = vunpack.c.l.bf16 %v3200_v63 }
 0x118   :  { %1816 = vmatpush1.bf16.msra.mxu0 %v3139_v1  ;;  %1988 = vmatpush1.bf16.msra.mxu1 %v3142_v2  ;;  %v2007_v1 = vunpack.c.h.bf16 %v3199_v60  ;;  %v2009_v2 = vunpack.c.h.bf16 %v3200_v63 }
 0x119   :  { %1817 = vmatprep.subr.bf16.mxu0 %v3147_v3  ;;  %1989 = vmatprep.subr.bf16.mxu1 %v3150_v4 }
 0x11c   :  { %1818 = vmatpush1.bf16.msra.mxu0 %v3145_v5  ;;  %1990 = vmatpush1.bf16.msra.mxu1 %v3148_v6 }
 0x11d   :  { %1819 = vmatprep.subr.bf16.mxu0 %v3153_v7  ;;  %1991 = vmatprep.subr.bf16.mxu1 %v3156_v8  ;;  %v3201_v7 = vld [vmem:[%s3399_s0 + $0x20] sm:$0xff] }
 0x11e   :  { %v2010_v8 = vunpack.c.l.bf16 %v3201_v7 }
 0x120   :  { %1820 = vmatpush1.bf16.msra.mxu0 %v3151_v9  ;;  %1992 = vmatpush1.bf16.msra.mxu1 %v3154_v10  ;;  %v3202_v9 = vld [vmem:[%s3399_s0 + $0x28] sm:$0xff] }
 0x121   :  { %1821 = vmatprep.subr.bf16.mxu0 %v3159_v11  ;;  %1993 = vmatprep.subr.bf16.mxu1 %v3162_v12  ;;  %v2012_v10 = vunpack.c.l.bf16 %v3202_v9 }
 0x124   :  { %1822 = vmatpush1.bf16.msra.mxu0 %v3157_v13  ;;  %1994 = vmatpush1.bf16.msra.mxu1 %v3160_v16 }
 0x125   :  { %2697 = vmatprep.subr.bf16.mxu0 %v3163_v18  ;;  %2719 = vmatprep.subr.bf16.mxu1 %v3164_v20  ;;  %v2011_v18 = vunpack.c.h.bf16 %v3201_v7  ;;  %v2013_v20 = vunpack.c.h.bf16 %v3202_v9 }
 0x127   :  { %1824 = vmatmul.mubr.bf16.vlgmr.msra.gmra.mrb[0].mxu0 %v2405_v21  ;;  %1996 = vmatmul.mubr.bf16.vlgmr.msra.gmra.mrb[0].mxu1 %v2405_v21 }
 0x128   :  { %2698 = vmatpush3.bf16.msra.mxu0 %v3165_v22  ;;  %2720 = vmatpush3.bf16.msra.mxu1 %v3166_v23 }
 0x129   :  { %2699 = vmatprep.subr.bf16.mxu0 %v3167_v24  ;;  %2721 = vmatprep.subr.bf16.mxu1 %v3168_v25 }
 0x12c   :  { %2700 = vmatpush3.bf16.msra.mxu0 %v3169_v14  ;;  %2722 = vmatpush3.bf16.msra.mxu1 %v3170_v15 }
 0x12d   :  { %2701 = vmatprep.subr.bf16.mxu0 %v3171_v26  ;;  %2723 = vmatprep.subr.bf16.mxu1 %v3172_v27 }
 0x130   :  { %2702 = vmatpush3.bf16.msra.mxu0 %v3173_v17  ;;  %2724 = vmatpush3.bf16.msra.mxu1 %v3174_v19 }
 0x131   :  { %2703 = vmatprep.subr.bf16.mxu0 %v3175_v28  ;;  %2725 = vmatprep.subr.bf16.mxu1 %v3176_v29 }
 0x134   :  { %2704 = vmatpush3.bf16.msra.mxu0 %v3177_v30  ;;  %2726 = vmatpush3.bf16.msra.mxu1 %v3178_v31 }
 0x135   :  { %2705 = vmatprep.subr.bf16.mxu0 %v3179_v32  ;;  %2727 = vmatprep.subr.bf16.mxu1 %v3180_v33 }
 0x138   :  { %2706 = vmatpush3.bf16.msra.mxu0 %v3181_v34  ;;  %2728 = vmatpush3.bf16.msra.mxu1 %v3182_v35 }
 0x139   :  { %2707 = vmatprep.subr.bf16.mxu0 %v3183_v36  ;;  %2729 = vmatprep.subr.bf16.mxu1 %v3184_v37  ;;  %v2663_v37 = vld [vmem:[%s3403_s4] ss:$0 sm:$0xff] }
 0x13c   :  { %2708 = vmatpush3.bf16.msra.mxu0 %v3185_v38  ;;  %2730 = vmatpush3.bf16.msra.mxu1 %v3186_v39 }
 0x13d   :  { %2709 = vmatprep.subr.bf16.mxu0 %v3187_v40  ;;  %2731 = vmatprep.subr.bf16.mxu1 %v3188_v41 }
 0x140   :  { %2710 = vmatpush3.bf16.msra.mxu0 %v3189_v42  ;;  %2732 = vmatpush3.bf16.msra.mxu1 %v3190_v43 }
 0x141   :  { %2711 = vmatprep.subr.bf16.mxu0 %v3191_v44  ;;  %2733 = vmatprep.subr.bf16.mxu1 %v3192_v45 }
 0x144   :  { %2712 = vmatpush3.bf16.msra.mxu0 %v3193_v46  ;;  %2734 = vmatpush3.bf16.msra.mxu1 %v3194_v47 }
 0x1fa   :  { %v1825_v59 = vpop.f32.mrb[0].mxu0  ;;  %v1997_v62 = vpop.f32.mrb[0].mxu1 }
 0x1fb   :  { %v2741_v3 = vadd.f32 %v1825_v59, %v325_v55  ;;  %v2745_v4 = vadd.f32 %v1997_v62, %v333_v56  ;;  %v1827_v5 = vpop.f32.mrb[1].mxu0  ;;  %v1999_v6 = vpop.f32.mrb[1].mxu1 }
 0x1fc   :  { %v2742_v11 = vadd.f32 %v1827_v5, %v329_v57  ;;  %v2746_v12 = vadd.f32 %v1999_v6, %v337_v58  ;;  %v1829_v13 = vpop.f32.mrb[2].mxu0  ;;  %v2001_v16 = vpop.f32.mrb[2].mxu1 }
 0x1fd   :  { %v2743_v21 = vadd.f32 %v1829_v13, %v325_v55  ;;  %v2747_v22 = vadd.f32 %v2001_v16, %v333_v56  ;;  %v1831_v23 = vpop.f32.mrb[3].mxu0  ;;  %v2003_v24 = vpop.f32.mrb[3].mxu1  ;;  %v2014_v15 = vmul.f32 %v2741_v3, %v2006_v61  ;;  %v2016_v26 = vmul.f32 %v2745_v4, %v2008_v0 }
 0x1fe   :  { %v2744_v25 = vadd.f32 %v1831_v23, %v329_v57  ;;  %v2748_v14 = vadd.f32 %v2003_v24, %v337_v58  ;;  %v2015_v19 = vmul.f32 %v2742_v11, %v2007_v1  ;;  %v2017_v28 = vmul.f32 %v2746_v12, %v2009_v2 }
 0x1ff   :  { %v2018_v27 = vmul.f32 %v2743_v21, %v2010_v8  ;;  %v2020_v17 = vmul.f32 %v2747_v22, %v2012_v10  ;;  %v2387_v57 = vstv %s3405_s6 }
 0x200   :  { %v2019_v29 = vmul.f32 %v2744_v25, %v2011_v18  ;;  %v2021_v30 = vmul.f32 %v2748_v14, %v2013_v20 }
 0x201   :  { %v2022_v31 = vpack.c.bf16 %v2018_v27, %v2014_v15  ;;  %v2024_v32 = vpack.c.bf16 %v2020_v17, %v2016_v26 }
 0x202   :  { %v2023_v33 = vpack.c.bf16 %v2019_v29, %v2015_v19  ;;  %v2025_v34 = vpack.c.bf16 %v2021_v30, %v2017_v28 }
 0x204   :  { %2321 = vmatprep.mubr.bf16.mxu0 %v2023_v33  ;;  %2362 = vmatprep.mubr.bf16.mxu1 %v2025_v34 }
 0x205   :  { %2322 = vmatmul.mubr.bf16.vlgmr.msra.gmra.mrb[4].mxu0 %v2022_v31  ;;  %2363 = vmatmul.mubr.bf16.vlgmr.msra.gmra.mrb[4].mxu1 %v2024_v32 }
 0x2d8   :  { %v2713_v35 = vpop.f32.mrb[4].mxu0  ;;  %v2735_v36 = vpop.f32.mrb[4].mxu1 }
 0x2d9   :  { %v2714_v38 = vpop.f32.mrb[5].mxu0  ;;  %v2736_v39 = vpop.f32.mrb[5].mxu1 }
 0x2da   :  { %v2715_v40 = vadd.f32 %v2714_v38, %v2713_v35  ;;  %v2737_v41 = vadd.f32 %v2736_v39, %v2735_v36  ;;  %v2716_v42 = vpop.f32.mrb[6].mxu0  ;;  %v2738_v43 = vpop.f32.mrb[6].mxu1 }
 0x2db   :  { %v2717_v44 = vpop.f32.mrb[7].mxu0  ;;  %v2739_v45 = vpop.f32.mrb[7].mxu1 }
 0x2dc   :  { %v2324_v46 = vadd.f32 %v2715_v40, %v2663_v37  ;;  %v2718_v47 = vadd.f32 %v2717_v44, %v2716_v42  ;;  %v2740_v48 = vadd.f32 %v2739_v45, %v2738_v43 }
 0x2de   :  { %v2365_v49 = vadd.f32 %v2737_v41, %v2324_v46  ;;  %v2327_v50 = vadd.f32 %v2718_v47, %v2663_v37 }
 0x2e0   :  { %3195 = vtanh.f32 %v2365_v49  ;;  %v2368_v51 = vadd.f32 %v2740_v48, %v2327_v50 }
 0x2e2   :  { %3197 = vtanh.f32 %v2368_v51 }
 0x2ea   :  { %v3196_v53 = vpop.eup %3195 }
 0x2eb   :  { %v2380_v54 = vmul.f32 %v3196_v53, %v2696_v52 }
 0x2ec   :  { %v3198_v55 = vpop.eup %3197 }
 0x2ed   :  { %2382 = vadd.xlane.f32.xlu0 %v2380_v54  ;;  %v2381_v56 = vmul.f32 %v3198_v55, %v2696_v52 }
 0x2f1   :  { %2384 = vadd.xlane.f32.xlu0 %v2381_v56 }
 0x37a   :  { %v2383_v58 = vpop.xlane.xlu0 %2382 }
 0x37b   :  { %v2388_v59 = vadd.f32 %v2387_v57, %v2383_v58 }
 0x37d   :  { %2391 = vst.msk [vmem:[%s3406_s7] sm:$0xff] %vm2390_vm0, %v2388_v59 }
 0x37e   :  { %v2385_v60 = vpop.xlane.xlu0 %2384 }
 0x37f   :  { %v2389_v61 = vadd.f32 %v2387_v57, %v2385_v60 }
 0x381   :  { %2392 = vst.msk [vmem:[%s3406_s7 + $0x8] sm:$0xff] %vm2390_vm0, %v2389_v61 }
 0x382   :  { %2397 = vsyncpa [#allocation4], 1 }
 0x383   :  { %2398 = vsyncpa [#allocation6], 1 }

</bundles_post_ra>
